<compile_context>
chip_gen: v5e
topology: v5e:2x2
jax: 0.10.0
libtpu: 0.0.40
codegen_flags: <defaults>
</compile_context>

<pallas_src>
import functools

import jax
import jax.numpy as jnp
from jax import lax
from jax.experimental import pallas as pl
from jax.experimental.pallas import tpu as pltpu

F32 = jnp.float32
BF16 = jnp.bfloat16
LANE = 128


def _vmem_limit_bytes():
    """Generation-aware scoped-VMEM budget (~3/4 of physical, capped at 100 MiB)."""
    cap = 64 * 1024 * 1024
    try:
        info = pltpu.get_tpu_info()
        cap = int(getattr(info, "vmem_capacity_bytes", cap) or cap)
    except Exception:
        pass
    return min((cap * 3) // 4, 100 * 1024 * 1024)


VMEM_LIMIT = _vmem_limit_bytes()


def _cparams(sem):
    return pltpu.CompilerParams(dimension_semantics=sem, vmem_limit_bytes=VMEM_LIMIT)


def _ceil_to(n, m):
    return ((n + m - 1) // m) * m


def _row_tile(n, target=512):
    """Largest power-of-two row tile <= target (>= 16) dividing n."""
    t = target
    while t >= 16:
        if n % t == 0:
            return t
        t //= 2
    # TODO(synk): for real meshes with N % 16 != 0, zero-pad vertices upstream
    # (zero mass / zero evecs rows) instead of falling back to a full-N block.
    raise ValueError(f"row count {n} must be a multiple of 16; pad inputs upstream")


def _lane_tile(n, target=512):
    """Largest multiple-of-128 tile <= target dividing n; else the full extent."""
    t = target
    while t >= 128:
        if n % t == 0:
            return t
        t //= 2
    return n


# ----------------------------- Pallas kernels -----------------------------------

def _linear_kernel(x_ref, w_ref, b_ref, o_ref):
    y = jnp.dot(x_ref[...].astype(BF16), w_ref[...].astype(BF16),
                preferred_element_type=F32) + b_ref[...]
    o_ref[...] = y.astype(o_ref.dtype)


@jax.jit
def pallas_linear(x, w, b):
    """y = x @ w + b; row-tiled, bf16 operands, f32 accumulation."""
    M, K = x.shape
    N = w.shape[1]
    b2 = jnp.asarray(b, F32).reshape(1, N)
    tm = _row_tile(M)
    return pl.pallas_call(
        _linear_kernel,
        out_shape=jax.ShapeDtypeStruct((M, N), F32),
        grid=(M // tm,),
        in_specs=[pl.BlockSpec((tm, K), lambda i: (i, 0)),
                  pl.BlockSpec((K, N), lambda i: (0, 0)),
                  pl.BlockSpec((1, N), lambda i: (0, 0))],
        out_specs=pl.BlockSpec((tm, N), lambda i: (i, 0)),
        compiler_params=_cparams(("parallel",)),
    )(x, w, b2)


def _spec_project_kernel(x_ref, ev_ref, mass_ref, evals_ref, t_ref, o_ref, acc_ref):
    # spec = evecs^T @ (mass * x), reduced over vertex tiles; finalize with the
    # learned diffusion coefficients exp(-evals * t).
    i = pl.program_id(0)

    @pl.when(i == 0)
    def _():
        acc_ref[...] = jnp.zeros_like(acc_ref)

    xm = (x_ref[...] * mass_ref[...]).astype(BF16)
    acc_ref[...] += lax.dot_general(ev_ref[...], xm, (((0,), (0,)), ((), ())),
                                    preferred_element_type=F32)

    @pl.when(i == pl.num_programs(0) - 1)
    def _():
        coefs = jnp.exp(-evals_ref[...] * t_ref[...])          # (Kp,1)*(1,C) -> (Kp,C)
        o_ref[...] = (coefs * acc_ref[...]).astype(o_ref.dtype)


@jax.jit
def pallas_spec_project(x, evecs_b16, mass, evals_pad, t_row):
    N, C = x.shape
    Kp = evecs_b16.shape[1]
    tm = _row_tile(N)
    return pl.pallas_call(
        _spec_project_kernel,
        out_shape=jax.ShapeDtypeStruct((Kp, C), BF16),
        grid=(N // tm,),
        in_specs=[pl.BlockSpec((tm, C), lambda i: (i, 0)),
                  pl.BlockSpec((tm, Kp), lambda i: (i, 0)),
                  pl.BlockSpec((tm, 1), lambda i: (i, 0)),
                  pl.BlockSpec((Kp, 1), lambda i: (0, 0)),
                  pl.BlockSpec((1, C), lambda i: (0, 0))],
        out_specs=pl.BlockSpec((Kp, C), lambda i: (0, 0)),
        scratch_shapes=[pltpu.VMEM((Kp, C), F32)],
        compiler_params=_cparams(("arbitrary",)),
    )(x, evecs_b16, mass.reshape(N, 1), evals_pad.reshape(Kp, 1), t_row)


def _diffuse_expand_kernel(ev_ref, sc_ref, o_ref):
    o_ref[...] = jnp.dot(ev_ref[...], sc_ref[...],
                         preferred_element_type=F32).astype(o_ref.dtype)


@jax.jit
def pallas_diffuse_expand(evecs_b16, sc):
    N, Kp = evecs_b16.shape
    C = sc.shape[1]
    tm = _row_tile(N)
    return pl.pallas_call(
        _diffuse_expand_kernel,
        out_shape=jax.ShapeDtypeStruct((N, C), BF16),
        grid=(N // tm,),
        in_specs=[pl.BlockSpec((tm, Kp), lambda i: (i, 0)),
                  pl.BlockSpec((Kp, C), lambda i: (0, 0))],
        out_specs=pl.BlockSpec((tm, C), lambda i: (i, 0)),
        compiler_params=_cparams(("parallel",)),
    )(evecs_b16, sc)


def _block_tail_kernel(gX_ref, gY_ref, xdr_ref, xd_ref, x_ref, aw_ref,
                       w1a_ref, w1b_ref, w1c_ref, b1_ref,
                       w2_ref, b2_ref, w3_ref, b3_ref, o_ref,
                       gx_acc, gy_acc, *, C):
    """Vertex-tiled gradient reduction + fused gradient features / MiniMLP / residual."""
    k = pl.program_id(1)

    @pl.when(k == 0)
    def _():
        gx_acc[...] = jnp.zeros_like(gx_acc)
        gy_acc[...] = jnp.zeros_like(gy_acc)

    xdr = xdr_ref[...]                                                # (tk, C) bf16
    gx_acc[...] += jnp.dot(gX_ref[...], xdr, preferred_element_type=F32)
    gy_acc[...] += jnp.dot(gY_ref[...], xdr, preferred_element_type=F32)

    @pl.when(k == pl.num_programs(1) - 1)
    def _():
        gx = gx_acc[...]                                              # (tm, C) f32
        gy = gy_acc[...]
        gx16 = gx.astype(BF16)
        gy16 = gy.astype(BF16)
        aw = aw_ref[...]                                              # (C, 2C) = [A_re|A_im]
        bx = jnp.dot(gx16, aw, preferred_element_type=F32)            # [gx@Are | gx@Aim]
        by = jnp.dot(gy16, aw, preferred_element_type=F32)            # [gy@Are | gy@Aim]
        breal = bx[:, :C] - by[:, C:]
        bimag = by[:, :C] + bx[:, C:]
        xg = jnp.tanh(gx * breal + gy * bimag)                        # (tm, C) f32

        x_in = x_ref[...]                                             # (tm, C) f32
        xd_tile = xd_ref[...]                                         # (tm, C) bf16

        # MiniMLP with the (3C,H) first weight split in three -> no (N,3C) concat.
        h = jnp.dot(x_in.astype(BF16), w1a_ref[...], preferred_element_type=F32)
        h = h + jnp.dot(xd_tile, w1b_ref[...], preferred_element_type=F32)
        h = h + jnp.dot(xg.astype(BF16), w1c_ref[...], preferred_element_type=F32)
        h = jnp.maximum(h + b1_ref[...], 0.0)
        h = jnp.maximum(jnp.dot(h.astype(BF16), w2_ref[...],
                                preferred_element_type=F32) + b2_ref[...], 0.0)
        y = jnp.dot(h.astype(BF16), w3_ref[...], preferred_element_type=F32) + b3_ref[...]
        o_ref[...] = y + x_in


@jax.jit
def pallas_block_tail(gradX_b16, gradY_b16, x_diffuse_b16, x, a_cat,
                      w1a, w1b, w1c, b1, w2, b2, w3, b3):
    N, C = x.shape
    H = w2.shape[0]
    tm = _row_tile(N)
    tk = _lane_tile(N)
    cc = lambda i, k: (0, 0)
    return pl.pallas_call(
        functools.partial(_block_tail_kernel, C=C),
        out_shape=jax.ShapeDtypeStruct((N, C), F32),
        grid=(N // tm, N // tk),
        in_specs=[pl.BlockSpec((tm, tk), lambda i, k: (i, k)),   # gradX strip
                  pl.BlockSpec((tm, tk), lambda i, k: (i, k)),   # gradY strip
                  pl.BlockSpec((tk, C), lambda i, k: (k, 0)),    # x_diffuse (reduction view)
                  pl.BlockSpec((tm, C), lambda i, k: (i, 0)),    # x_diffuse (row view)
                  pl.BlockSpec((tm, C), lambda i, k: (i, 0)),    # x (MLP input / residual)
                  pl.BlockSpec((C, 2 * C), cc),                  # [A_re | A_im]
                  pl.BlockSpec((C, H), cc), pl.BlockSpec((C, H), cc),
                  pl.BlockSpec((C, H), cc), pl.BlockSpec((1, H), cc),
                  pl.BlockSpec((H, H), cc), pl.BlockSpec((1, H), cc),
                  pl.BlockSpec((H, C), cc), pl.BlockSpec((1, C), cc)],
        out_specs=pl.BlockSpec((tm, C), lambda i, k: (i, 0)),
        scratch_shapes=[pltpu.VMEM((tm, C), F32), pltpu.VMEM((tm, C), F32)],
        compiler_params=_cparams(("parallel", "arbitrary")),
    )(gradX_b16, gradY_b16, x_diffuse_b16, x_diffuse_b16, x, a_cat,
      w1a, w1b, w1c, b1, w2, b2, w3, b3)


def _matmul_bt_kernel(a_ref, b_ref, o_ref):
    # y = a @ b.T (transpose folded into dot_general, no XLA transpose)
    a = a_ref[...]
    b = b_ref[...]
    if a.dtype != BF16:
        a = a.astype(BF16)
    if b.dtype != BF16:
        b = b.astype(BF16)
    o_ref[...] = lax.dot_general(a, b, (((1,), (1,)), ((), ())),
                                 preferred_element_type=F32).astype(o_ref.dtype)


@jax.jit
def pallas_matmul_bt(a, b):
    """a @ b.T with a:(M,K), b:(N,K)."""
    M, K = a.shape
    Nb = b.shape[0]
    tm = _row_tile(M)
    return pl.pallas_call(
        _matmul_bt_kernel,
        out_shape=jax.ShapeDtypeStruct((M, Nb), F32),
        grid=(M // tm,),
        in_specs=[pl.BlockSpec((tm, K), lambda i: (i, 0)),
                  pl.BlockSpec((Nb, K), lambda i: (0, 0))],
        out_specs=pl.BlockSpec((tm, Nb), lambda i: (i, 0)),
        compiler_params=_cparams(("parallel",)),
    )(a, b)


def _matmul_tn_kernel(a_ref, b_ref, o_ref, acc_ref):
    i = pl.program_id(0)

    @pl.when(i == 0)
    def _():
        acc_ref[...] = jnp.zeros_like(acc_ref)

    a = a_ref[...]
    b = b_ref[...]
    if a.dtype != BF16:
        a = a.astype(BF16)
    if b.dtype != BF16:
        b = b.astype(BF16)
    acc_ref[...] += lax.dot_general(a, b, (((0,), (0,)), ((), ())),
                                    preferred_element_type=F32)

    @pl.when(i == pl.num_programs(0) - 1)
    def _():
        o_ref[...] = acc_ref[...]


@jax.jit
def pallas_matmul_tn(a, b):
    """a.T @ b with a:(N,Ka), b:(N,Kb) -> (Ka,Kb); reduction over row tiles."""
    N, Ka = a.shape
    Kb = b.shape[1]
    tm = _row_tile(N)
    return pl.pallas_call(
        _matmul_tn_kernel,
        out_shape=jax.ShapeDtypeStruct((Ka, Kb), F32),
        grid=(N // tm,),
        in_specs=[pl.BlockSpec((tm, Ka), lambda i: (i, 0)),
                  pl.BlockSpec((tm, Kb), lambda i: (i, 0))],
        out_specs=pl.BlockSpec((Ka, Kb), lambda i: (0, 0)),
        scratch_shapes=[pltpu.VMEM((Ka, Kb), F32)],
        compiler_params=_cparams(("arbitrary",)),
    )(a, b)


def _softcorr_kernel(x_ref, yc_ref, v_ref, o_ref, m_ref, l_ref, acc_ref,
                     *, sigma, y_from_cyx):
    """Fused: out = softmax_rows(sigma * cos(x, y)) @ v  with online softmax over Ny.

    Row-normalization of x (and y) is done in-kernel; logits use bf16 MXU operands,
    softmax state (m, l, acc) stays f32.  In refine mode the y tile is recomputed
    in-kernel as rownorm(evecs_y_tile @ Cyx.T) so it never touches HBM.
    """
    j = pl.program_id(1)

    @pl.when(j == 0)
    def _():
        m_ref[...] = jnp.full_like(m_ref, -jnp.inf)
        l_ref[...] = jnp.zeros_like(l_ref)
        acc_ref[...] = jnp.zeros_like(acc_ref)

    x = x_ref[...].astype(F32)
    x = x * lax.rsqrt(jnp.sum(x * x, axis=1, keepdims=True) + 1e-12)
    x16 = x.astype(BF16)

    v = v_ref[...]                                                   # (ty, Kp) bf16
    if y_from_cyx:
        y = lax.dot_general(v, yc_ref[...], (((1,), (1,)), ((), ())),
                            preferred_element_type=F32)              # Ey_tile @ Cyx.T
    else:
        y = yc_ref[...].astype(F32)
    y = y * lax.rsqrt(jnp.sum(y * y, axis=1, keepdims=True) + 1e-12)
    y16 = y.astype(BF16)

    s = sigma * lax.dot_general(x16, y16, (((1,), (1,)), ((), ())),
                                preferred_element_type=F32)          # (tx, ty) f32
    m_prev = m_ref[...]
    m_new = jnp.maximum(m_prev, jnp.max(s, axis=1, keepdims=True))
    alpha = jnp.exp(m_prev - m_new)
    p = jnp.exp(s - m_new)
    l_ref[...] = alpha * l_ref[...] + jnp.sum(p, axis=1, keepdims=True)
    acc_ref[...] = alpha * acc_ref[...] + jnp.dot(p.astype(BF16), v,
                                                  preferred_element_type=F32)
    m_ref[...] = m_new

    @pl.when(j == pl.num_programs(1) - 1)
    def _():
        o_ref[...] = (acc_ref[...] *
                      pl.reciprocal(l_ref[...], approx=True)).astype(o_ref.dtype)


@functools.partial(jax.jit, static_argnames=("sigma",))
def pallas_softcorr_feat(x, y, v_b16, sigma=100.0):
    """Z = softmax_rows(sigma * cos(x, y)) @ v ; x/y raw features (normalized in-kernel)."""
    Nx, Cx = x.shape
    Ny, Cy = y.shape
    Kp = v_b16.shape[1]
    tx = _row_tile(Nx)
    ty = _row_tile(Ny)
    return pl.pallas_call(
        functools.partial(_softcorr_kernel, sigma=sigma, y_from_cyx=False),
        out_shape=jax.ShapeDtypeStruct((Nx, Kp), BF16),
        grid=(Nx // tx, Ny // ty),
        in_specs=[pl.BlockSpec((tx, Cx), lambda i, j: (i, 0)),
                  pl.BlockSpec((ty, Cy), lambda i, j: (j, 0)),
                  pl.BlockSpec((ty, Kp), lambda i, j: (j, 0))],
        out_specs=pl.BlockSpec((tx, Kp), lambda i, j: (i, 0)),
        scratch_shapes=[pltpu.VMEM((tx, 1), F32),
                        pltpu.VMEM((tx, 1), F32),
                        pltpu.VMEM((tx, Kp), F32)],
        compiler_params=_cparams(("parallel", "arbitrary")),
    )(x, y, v_b16)


@functools.partial(jax.jit, static_argnames=("sigma",))
def pallas_softcorr_refine(x, cyx_b16, v_b16, sigma=100.0):
    """Z = softmax_rows(sigma * cos(x, Ey @ Cyx.T)) @ Ey ; y-producer fused in-kernel."""
    Nx, Kx = x.shape
    Ny, Kp = v_b16.shape
    tx = _row_tile(Nx)
    ty = _row_tile(Ny)
    return pl.pallas_call(
        functools.partial(_softcorr_kernel, sigma=sigma, y_from_cyx=True),
        out_shape=jax.ShapeDtypeStruct((Nx, Kp), BF16),
        grid=(Nx // tx, Ny // ty),
        in_specs=[pl.BlockSpec((tx, Kx), lambda i, j: (i, 0)),
                  pl.BlockSpec((Kp, Kp), lambda i, j: (0, 0)),
                  pl.BlockSpec((ty, Kp), lambda i, j: (j, 0))],
        out_specs=pl.BlockSpec((tx, Kp), lambda i, j: (i, 0)),
        scratch_shapes=[pltpu.VMEM((tx, 1), F32),
                        pltpu.VMEM((tx, 1), F32),
                        pltpu.VMEM((tx, Kp), F32)],
        compiler_params=_cparams(("parallel", "arbitrary")),
    )(x, cyx_b16, v_b16)


def _sq_err_kernel(a_ref, b_ref, o_ref, acc_ref):
    i = pl.program_id(0)

    @pl.when(i == 0)
    def _():
        acc_ref[...] = jnp.zeros_like(acc_ref)

    d = a_ref[...] - b_ref[...]
    acc_ref[...] += jnp.broadcast_to(jnp.sum(d * d), (1, 1))

    @pl.when(i == pl.num_programs(0) - 1)
    def _():
        o_ref[...] = acc_ref[...]


@jax.jit
def pallas_sq_err_sum(a, b):
    M, C = a.shape
    tm = _row_tile(M)
    return pl.pallas_call(
        _sq_err_kernel,
        out_shape=jax.ShapeDtypeStruct((1, 1), F32),
        grid=(M // tm,),
        in_specs=[pl.BlockSpec((tm, C), lambda i: (i, 0)),
                  pl.BlockSpec((tm, C), lambda i: (i, 0))],
        out_specs=pl.BlockSpec((1, 1), lambda i: (0, 0)),
        scratch_shapes=[pltpu.VMEM((1, 1), F32)],
        compiler_params=_cparams(("arbitrary",)),
    )(a, b)


# ----------------------------- parameter init -----------------------------------

def init_linear(key, fan_in, fan_out, bias=True):
    kw, kb = jax.random.split(key)
    bound = 1.0 / (fan_in ** 0.5)
    w = jax.random.uniform(kw, (fan_in, fan_out), F32, -bound, bound)
    b = jax.random.uniform(kb, (fan_out,), F32, -bound, bound) if bias else None
    return w, b


def init_params(key, C_in, C_out, C_width=128, N_block=4):
    keys = jax.random.split(key, 2 + N_block)
    first_w, first_b = init_linear(keys[0], C_in, C_width)
    last_w, last_b = init_linear(keys[1], C_width, C_out)
    # Pad last_lin to a 128-lane-dense output width with zero columns; padded
    # feature columns are exactly zero so cosine similarities are unchanged.
    pad_out = _ceil_to(C_out, LANE)
    last_w_pad = jnp.zeros((C_width, pad_out), F32).at[:, :C_out].set(last_w)
    last_b_pad = jnp.zeros((pad_out,), F32).at[:C_out].set(last_b)

    params = {
        "first_w": first_w.astype(BF16), "first_b": first_b,
        "last_w": last_w_pad.astype(BF16), "last_b": last_b_pad,
        "blocks": [],
    }
    for i in range(N_block):
        bk = jax.random.split(keys[2 + i], 6)
        a_re = init_linear(bk[1], C_width, C_width, bias=False)[0]
        a_im = init_linear(bk[2], C_width, C_width, bias=False)[0]
        w1, b1 = init_linear(bk[3], 3 * C_width, C_width)   # MiniMLP layer 0 (fan_in=3C)
        w2, b2 = init_linear(bk[4], C_width, C_width)
        w3, b3 = init_linear(bk[5], C_width, C_width)
        params["blocks"].append({
            # reference inits diffusion_time to 0 then clamps to 1e-8; small positive
            # values (still clamped in forward) exercise diffusion non-trivially.
            "diffusion_time": jax.random.uniform(bk[0], (C_width,), F32, 0.0, 0.1),
            # Concatenated rotation weight for one 256-wide MXU pass: [A_re | A_im].
            "A_cat": jnp.concatenate([a_re, a_im], axis=1).astype(BF16),
            # Split (3C,H) first-MLP weight: x@W1a + xd@W1b + xg@W1c == concat(...)@W1.
            "w1a": w1[:C_width].astype(BF16),
            "w1b": w1[C_width:2 * C_width].astype(BF16),
            "w1c": w1[2 * C_width:].astype(BF16),
            "b1": b1.reshape(1, -1),
            "w2": w2.astype(BF16), "b2": b2.reshape(1, -1),
            "w3": w3.astype(BF16), "b3": b3.reshape(1, -1),
        })
    return params


# ----------------------------- model forward -------------------------------------

def prep_shape_operators(mass, evals, evecs, gradX, gradY):
    """One-time per-shape prep: 128-lane zero-padding + bf16 casts of heavy operators."""
    N, K = evecs.shape
    Kp = _ceil_to(K, LANE)
    evecs_pad = jnp.zeros((N, Kp), F32).at[:, :K].set(evecs.astype(F32))
    evals_pad = jnp.zeros((Kp,), F32).at[:K].set(evals.astype(F32))
    return {
        "mass": mass.astype(F32),
        "evals_pad": evals_pad,
        "evecs_pad": evecs_pad,
        "evecs_pad_b16": evecs_pad.astype(BF16),
        "gradX_b16": gradX.astype(BF16),
        "gradY_b16": gradY.astype(BF16),
        "k_eig": K,
    }


def diffusion_net_forward(params, x_in, ops):
    """DiffusionNet forward; outputs_at='vertices', spectral diffusion, eval mode."""
    x = pallas_linear(x_in, params["first_w"], params["first_b"])
    for blk in params["blocks"]:
        t_row = jnp.maximum(blk["diffusion_time"], 1e-8).reshape(1, -1)  # clamp(min=1e-8)
        sc = pallas_spec_project(x, ops["evecs_pad_b16"], ops["mass"],
                                 ops["evals_pad"], t_row)
        x_diffuse = pallas_diffuse_expand(ops["evecs_pad_b16"], sc)
        # fused gradient features + MLP (dropout = identity in eval) + residual,
        # with the N^2 gradX/gradY reduction tiled on a second grid axis
        x = pallas_block_tail(ops["gradX_b16"], ops["gradY_b16"], x_diffuse, x,
                              blk["A_cat"],
                              blk["w1a"], blk["w1b"], blk["w1c"], blk["b1"],
                              blk["w2"], blk["b2"], blk["w3"], blk["b3"])
    return pallas_linear(x, params["last_w"], params["last_b"])   # (N, 128), zero-padded


def rfmnet1_forward(params,
                    descs_x, massvec_x, evals_x, evecs_x, gs_x, gradX_x, gradY_x,
                    elevals_x, elevecs_x, name_x,
                    descs_y, massvec_y, evals_y, evecs_y, gs_y, gradX_y, gradY_y,
                    elevals_y, elevecs_y, name_y,
                    sigma=100.0, k_init=30, k_step=2, k_final=100):
    ops_x = prep_shape_operators(massvec_x, evals_x, evecs_x, gradX_x, gradY_x)
    ops_y = prep_shape_operators(massvec_y, evals_y, evecs_y, gradX_y, gradY_y)

    feat_x = diffusion_net_forward(params, descs_x, ops_x)
    feat_y = diffusion_net_forward(params, descs_y, ops_y)

    # p121 = nn_search(feat_y, feat_x) in the reference is computed then discarded;
    # dropped here (dead code).

    Ex = ops_x["evecs_pad"]                     # (Nx, Kp) f32
    Ey_b16 = ops_y["evecs_pad_b16"]             # (Ny, Kp) bf16
    ExM = Ex * massvec_x.astype(F32)[:, None]   # loop-invariant, hoisted
    K_eig = ops_x["k_eig"]
    Kp = Ex.shape[1]
    col_ids = jnp.arange(Kp)

    # Initial soft correspondence fused with row-norm and projection:
    # Z = softmax_rows(sigma*cos(feat_x, feat_y)) @ evecs_y_pad   (bf16, never P12 in HBM)
    Z = pallas_softcorr_feat(feat_x, feat_y, Ey_b16, sigma=sigma)

    prev_keff = -1
    Exk = ExMk_b16 = colmask = Cyx = None
    for k in range(k_init, k_final, k_step):
        keff = min(k, K_eig)                    # torch slicing clips at K_eig
        if keff != prev_keff:                   # hoist mask-dependent work
            colmask = (col_ids < keff).astype(F32)
            Exk = Ex * colmask                  # evecs_x[:, :k] zero-padded to Kp lanes
            ExMk_b16 = (ExM * colmask).astype(BF16)
            prev_keff = keff
        # Cyx = (evecs_sx * mass).T @ (P12 @ evecs_sy), masked to the k x k block
        Cyx = pallas_matmul_tn(ExMk_b16, Z) * colmask[None, :]
        # new P12 @ evecs_y_pad; emb_y = rownorm(evecs_sy @ Cyx.T) is recomputed
        # in-kernel per tile, so neither P12 nor emb_y is materialized in HBM.
        Z = pallas_softcorr_refine(Exk, Cyx.astype(BF16), Ey_b16, sigma=sigma)

    # loss = MSE(evecs_sx, P12 @ evecs_sy @ Cyx.T) over the (Nx, k_last) block
    pred = pallas_matmul_bt(Z, Cyx)             # padded columns are exactly zero
    sq = pallas_sq_err_sum(Exk, pred)
    loss = sq[0, 0] / (Exk.shape[0] * prev_keff)
    return loss


# ----------------------------- main ----------------------------------------------

if __name__ == "__main__":
    N, C_in, C_out, K_eig, C_width = 256, 16, 32, 32, 128

    key = jax.random.PRNGKey(0)
    k_params, k_data = jax.random.split(key)
    params = init_params(k_params, C_in, C_out, C_width=C_width, N_block=4)

    def make_shape_inputs(keys):
        descs = jax.random.normal(keys[0], (N, C_in), F32)
        mass = jax.random.uniform(keys[1], (N,), F32, 0.5, 1.5)
        evals = jnp.sort(jax.random.uniform(keys[2], (K_eig,), F32, 0.0, 5.0))
        evecs = jax.random.normal(keys[3], (N, K_eig), F32) * 0.1
        gradX = jax.random.normal(keys[4], (N, N), F32) / jnp.sqrt(float(N))
        gradY = jax.random.normal(keys[5], (N, N), F32) / jnp.sqrt(float(N))
        gs = jax.random.uniform(keys[6], (4, K_eig), F32)        # unused in forward
        elevals = jnp.zeros((K_eig,), F32)                       # unused in forward
        elevecs = jnp.zeros((N, K_eig), F32)                     # unused in forward
        return descs, mass, evals, evecs, gs, gradX, gradY, elevals, elevecs

    ks = jax.random.split(k_data, 14)
    inputs_x = make_shape_inputs(ks[:7])
    inputs_y = make_shape_inputs(ks[7:])

    loss = rfmnet1_forward(params, *inputs_x, "shape_x", *inputs_y, "shape_y")
    loss = jax.block_until_ready(loss)
    assert bool(jnp.isfinite(loss)), f"non-finite loss: {loss}"
    print("KERNEL_OK")
</pallas_src>

<mosaic_0001>
module attributes {stable_mosaic.version = 11 : i64} {
  func.func @_linear_kernel(%arg0: i32, %arg1: memref<256x16xf32, #tpu.memory_space<vmem>>, %arg2: memref<16x128xbf16, #tpu.memory_space<vmem>>, %arg3: memref<1x128xf32, #tpu.memory_space<vmem>>, %arg4: memref<256x128xf32, #tpu.memory_space<vmem>>) attributes {dimension_semantics = [#tpu.dimension_semantics<parallel>], iteration_bounds = array<i64: 1>, scalar_prefetch = 0 : i64, scratch_operands = 0 : i64, tpu.core_type = #tpu.core_type<tc>, window_params = [{transform_indices = @transform_0, window_bounds = array<i64: 256, 16>}, {pipeline_mode = #tpu.pipeline_mode<synchronous>, transform_indices = @transform_1, window_bounds = array<i64: 16, 128>}, {pipeline_mode = #tpu.pipeline_mode<synchronous>, transform_indices = @transform_2, window_bounds = array<i64: 1, 128>}, {transform_indices = @transform_3, window_bounds = array<i64: 256, 128>}]} {
    %c0 = arith.constant 0 : index
    %c0_0 = arith.constant 0 : index
    %0 = vector.load %arg1[%c0, %c0_0] : memref<256x16xf32, #tpu.memory_space<vmem>>, vector<256x16xf32>
    %1 = arith.truncf %0 : vector<256x16xf32> to vector<256x16xbf16>
    %c0_1 = arith.constant 0 : index
    %c0_2 = arith.constant 0 : index
    %2 = vector.load %arg2[%c0_1, %c0_2] : memref<16x128xbf16, #tpu.memory_space<vmem>>, vector<16x128xbf16>
    %cst = arith.constant dense<0.000000e+00> : vector<256x128xf32>
    %3 = tpu.matmul %1, %2, %cst {dimension_numbers = #tpu.dot_dimension_numbers<[1], [0], [0], [1], [0, 0, 1, 1], [], []>} : vector<256x16xbf16>, vector<16x128xbf16>, vector<256x128xf32> -> vector<256x128xf32>
    %c0_3 = arith.constant 0 : index
    %c0_4 = arith.constant 0 : index
    %4 = vector.load %arg3[%c0_3, %c0_4] : memref<1x128xf32, #tpu.memory_space<vmem>>, vector<1x128xf32>
    %5 = vector.broadcast %4 : vector<1x128xf32> to vector<256x128xf32>
    %6 = arith.addf %3, %5 : vector<256x128xf32>
    %c0_5 = arith.constant 0 : index
    %c0_6 = arith.constant 0 : index
    %7 = vector.load %arg4[%c0_5, %c0_6] : memref<256x128xf32, #tpu.memory_space<vmem>>, vector<256x128xf32>
    tpu.vector_store %arg4[%c0_5, %c0_6], %6 {strides = array<i32>} : memref<256x128xf32, #tpu.memory_space<vmem>>, vector<256x128xf32>,
    return
  }
  func.func @transform_0(%arg0: i32) -> (i32, i32) {
    %c0_i32 = arith.constant 0 : i32
    %c0_i32_0 = arith.constant 0 : i32
    return %arg0, %c0_i32 : i32, i32
  }
  func.func @transform_1(%arg0: i32) -> (i32, i32) {
    %c0_i32 = arith.constant 0 : i32
    %c0_i32_0 = arith.constant 0 : i32
    %c0_i32_1 = arith.constant 0 : i32
    return %c0_i32, %c0_i32_0 : i32, i32
  }
  func.func @transform_2(%arg0: i32) -> (i32, i32) {
    %c0_i32 = arith.constant 0 : i32
    %c0_i32_0 = arith.constant 0 : i32
    %c0_i32_1 = arith.constant 0 : i32
    return %c0_i32, %c0_i32_0 : i32, i32
  }
  func.func @transform_3(%arg0: i32) -> (i32, i32) {
    %c0_i32 = arith.constant 0 : i32
    %c0_i32_0 = arith.constant 0 : i32
    return %arg0, %c0_i32 : i32, i32
  }
}

</mosaic_0001>

<bundles_post_ra>
// kernel: pallas_linear.1
= control target key start
LH: loop header
LB: loop body
LE: loop exit
PB: predicated region body
PF: predicated region fallthrough
CT: control target
= control target key end

     0   :  { %vm76_vm0 = vcmask 130048   ;;  %s496_s0 = inlined_call_operand.vmem [shape: f32[256,16], index: 0, kind: input, shape index: {}]   ;;  %s497_s1 = inlined_call_operand.vmem [shape: bf16[16,128], index: 1, kind: input, shape index: {}]   ;;  %s498_s2 = inlined_call_operand.vmem [shape: f32[1,128], index: 2, kind: input, shape index: {}]   ;;  %s499_s3 = inlined_call_operand.hbm [shape: f32[256,128], index: 3, kind: output, shape index: {}]  }
   0x1   :  { %v284_v0 = vld [vmem:[%s497_s1] sm:$0xff]  ;;  %v17_v2 = vld [vmem:[%s496_s0 + $0x8] sm:$0xff] }
   0x2   :  { %v16_v1 = vld [vmem:[%s496_s0] sm:$0xff]  ;;  %v25_v5 = vld [vmem:[%s496_s0 + $0x48] sm:$0xff]  ;;  %132 = vmatpush.bf16.msra.mxu0 %v284_v0  ;;  %285 = vmatpush.bf16.msra.mxu1 %v284_v0 }
   0x3   :  { %v48_v3 = vpack.c.bf16 %v17_v2, %v16_v1  ;;  %v24_v4 = vld [vmem:[%s496_s0 + $0x40] sm:$0xff]  ;;  %v33_v8 = vld [vmem:[%s496_s0 + $0x88] sm:$0xff]  ;;  %286 = vmatpush.bf16.msra.mxu2 %v284_v0  ;;  %287 = vmatpush.bf16.msra.mxu3 %v284_v0 }
   0x4   :  { %v32_v6 = vld [vmem:[%s496_s0 + $0x80] sm:$0xff]  ;;  %v52_v7 = vpack.c.bf16 %v25_v5, %v24_v4  ;;  %v41_v10 = vld [vmem:[%s496_s0 + $0xc8] sm:$0xff] }
   0x5   :  { %v40_v9 = vld [vmem:[%s496_s0 + $0xc0] sm:$0xff]  ;;  %v56_v11 = vpack.c.bf16 %v33_v8, %v32_v6  ;;  %268 = vmatmul.msk.bf16.vlgmr.msra.gmra.mxu0 %vm76_vm0, %v48_v3 }
   0x6   :  { %v60_v12 = vpack.c.bf16 %v41_v10, %v40_v9  ;;  %272 = vmatmul.msk.bf16.vlgmr.msra.gmra.mxu1 %vm76_vm0, %v52_v7 }
   0x7   :  { %276 = vmatmul.msk.bf16.vlgmr.msra.gmra.mxu2 %vm76_vm0, %v56_v11 }
   0x8   :  { %280 = vmatmul.msk.bf16.vlgmr.msra.gmra.mxu3 %vm76_vm0, %v60_v12 }
   0x9   :  { %8 = vsyncpa [#allocation3], 0  ;;  %v18_v13 = vld [vmem:[%s496_s0 + $0x10] sm:$0xff]  ;;  %v19_v14 = vld [vmem:[%s496_s0 + $0x18] sm:$0xff]  ;;  %s252_s25 = sshll.u32 %s499_s3, 4  ;;  %s319_s26 = smov 128   ;;  %s253_s25 = int_to_ptr.hbm [resolvable:$true] %s252_s25 }
   0xa   :  { %v26_v15 = vld [vmem:[%s496_s0 + $0x50] sm:$0xff]  ;;  %v27_v16 = vld [vmem:[%s496_s0 + $0x58] sm:$0xff]  ;;  %v49_v21 = vpack.c.bf16 %v19_v14, %v18_v13  ;;  %v20_v25 = vld [vmem:[%s496_s0 + $0x20] sm:$0xff]  ;;  %s320_s27 = smov 8  }
   0xb   :  { %v34_v17 = vld [vmem:[%s496_s0 + $0x90] sm:$0xff]  ;;  %v35_v18 = vld [vmem:[%s496_s0 + $0x98] sm:$0xff]  ;;  %v53_v22 = vpack.c.bf16 %v27_v16, %v26_v15  ;;  %v21_v26 = vld [vmem:[%s496_s0 + $0x28] sm:$0xff] }
   0xc   :  { %v42_v19 = vld [vmem:[%s496_s0 + $0xd0] sm:$0xff]  ;;  %v43_v20 = vld [vmem:[%s496_s0 + $0xd8] sm:$0xff]  ;;  %v57_v23 = vpack.c.bf16 %v35_v18, %v34_v17  ;;  %v28_v27 = vld [vmem:[%s496_s0 + $0x60] sm:$0xff]  ;;  %v50_v33 = vpack.c.bf16 %v21_v26, %v20_v25 }
   0xd   :  { %v61_v24 = vpack.c.bf16 %v43_v20, %v42_v19  ;;  %v29_v28 = vld [vmem:[%s496_s0 + $0x68] sm:$0xff]  ;;  %v36_v29 = vld [vmem:[%s496_s0 + $0xa0] sm:$0xff]  ;;  %v22_v37 = vld [vmem:[%s496_s0 + $0x30] sm:$0xff] }
   0xe   :  { %v37_v30 = vld [vmem:[%s496_s0 + $0xa8] sm:$0xff]  ;;  %v44_v31 = vld [vmem:[%s496_s0 + $0xe0] sm:$0xff]  ;;  %v54_v34 = vpack.c.bf16 %v29_v28, %v28_v27  ;;  %v23_v38 = vld [vmem:[%s496_s0 + $0x38] sm:$0xff] }
   0xf   :  { %v45_v32 = vld [vmem:[%s496_s0 + $0xe8] sm:$0xff]  ;;  %v58_v35 = vpack.c.bf16 %v37_v30, %v36_v29  ;;  %v30_v39 = vld [vmem:[%s496_s0 + $0x70] sm:$0xff]  ;;  %v31_v40 = vld [vmem:[%s496_s0 + $0x78] sm:$0xff]  ;;  %v51_v45 = vpack.c.bf16 %v23_v38, %v22_v37 }
  0x10   :  { %v62_v36 = vpack.c.bf16 %v45_v32, %v44_v31  ;;  %v38_v41 = vld [vmem:[%s496_s0 + $0xb0] sm:$0xff]  ;;  %v39_v42 = vld [vmem:[%s496_s0 + $0xb8] sm:$0xff]  ;;  %v55_v46 = vpack.c.bf16 %v31_v40, %v30_v39  ;;  %v459_v49 = vld [vmem:[%s498_s2] ss:$0 sm:$0xff] }
  0x11   :  { %v46_v43 = vld [vmem:[%s496_s0 + $0xf0] sm:$0xff]  ;;  %v47_v44 = vld [vmem:[%s496_s0 + $0xf8] sm:$0xff]  ;;  %v59_v47 = vpack.c.bf16 %v39_v42, %v38_v41  ;;  %s318_s0 = smov [#allocation2]  }
  0x12   :  { %v63_v48 = vpack.c.bf16 %v47_v44, %v46_v43  ;;  %s250_s2 = sshll.u32 %s318_s0, 4  ;;  %s251_s2 = int_to_ptr.vmem [resolvable:$true] %s250_s2 }
  0x15   :  { %269 = vmatmul.msk.bf16.gmra.mxu0 %vm76_vm0, %v49_v21 }
  0x16   :  { %273 = vmatmul.msk.bf16.gmra.mxu1 %vm76_vm0, %v53_v22 }
  0x17   :  { %277 = vmatmul.msk.bf16.gmra.mxu2 %vm76_vm0, %v57_v23 }
  0x18   :  { %281 = vmatmul.msk.bf16.gmra.mxu3 %vm76_vm0, %v61_v24 }
  0x25   :  { %270 = vmatmul.msk.bf16.gmra.mxu0 %vm76_vm0, %v50_v33 }
  0x26   :  { %274 = vmatmul.msk.bf16.gmra.mxu1 %vm76_vm0, %v54_v34 }
  0x27   :  { %278 = vmatmul.msk.bf16.gmra.mxu2 %vm76_vm0, %v58_v35 }
  0x28   :  { %282 = vmatmul.msk.bf16.gmra.mxu3 %vm76_vm0, %v62_v36 }
  0x35   :  { %271 = vmatmul.msk.bf16.gmra.mxu0 %vm76_vm0, %v51_v45 }
  0x36   :  { %275 = vmatmul.msk.bf16.gmra.mxu1 %vm76_vm0, %v55_v46 }
  0x37   :  { %279 = vmatmul.msk.bf16.gmra.mxu2 %vm76_vm0, %v59_v47 }
  0x38   :  { %283 = vmatmul.msk.bf16.gmra.mxu3 %vm76_vm0, %v63_v48 }
  0x82   :  { %v134_v50 = vpop.f32.mrf.mxu0 }
  0x83   :  { %v154_v51 = vpop.f32.mrf.mxu1  ;;  %v135_v52 = vadd.f32 %v459_v49, %v134_v50 }
  0x84   :  { %v155_v53 = vadd.f32 %v459_v49, %v154_v51 }
  0x85   :  { %214 = vst [vmem:[#allocation2] sm:$0xff] %v135_v52 }
  0x86   :  { %222 = vst [vmem:[#allocation2 + $0x40] sm:$0xff] %v155_v53 }
  0x8a   :  { %v174_v54 = vpop.f32.mrf.mxu2  ;;  %v136_v58 = vpop.f32.mrf.mxu0 }
  0x8b   :  { %v194_v55 = vpop.f32.mrf.mxu3  ;;  %v175_v56 = vadd.f32 %v459_v49, %v174_v54  ;;  %v156_v59 = vpop.f32.mrf.mxu1  ;;  %v137_v60 = vadd.f32 %v459_v49, %v136_v58 }
  0x8c   :  { %v195_v57 = vadd.f32 %v459_v49, %v194_v55  ;;  %v157_v61 = vadd.f32 %v459_v49, %v156_v59 }
  0x8d   :  { %230 = vst [vmem:[#allocation2 + $0x80] sm:$0xff] %v175_v56 }
  0x8e   :  { %238 = vst [vmem:[#allocation2 + $0xc0] sm:$0xff] %v195_v57 }
  0x8f   :  { %215 = vst [vmem:[#allocation2 + $0x8] sm:$0xff] %v137_v60 }
  0x90   :  { %223 = vst [vmem:[#allocation2 + $0x48] sm:$0xff] %v157_v61 }
  0x92   :  { %v176_v62 = vpop.f32.mrf.mxu2  ;;  %v139_v2 = vpop.f32.mrf.mxu0 }
  0x93   :  { %v196_v63 = vpop.f32.mrf.mxu3  ;;  %v177_v0 = vadd.f32 %v459_v49, %v176_v62  ;;  %v159_v3 = vpop.f32.mrf.mxu1  ;;  %v140_v4 = vadd.f32 %v459_v49, %v139_v2 }
  0x94   :  { %v197_v1 = vadd.f32 %v459_v49, %v196_v63  ;;  %v160_v5 = vadd.f32 %v459_v49, %v159_v3 }
  0x95   :  { %231 = vst [vmem:[#allocation2 + $0x88] sm:$0xff] %v177_v0 }
  0x96   :  { %239 = vst [vmem:[#allocation2 + $0xc8] sm:$0xff] %v197_v1 }
  0x97   :  { %216 = vst [vmem:[#allocation2 + $0x10] sm:$0xff] %v140_v4 }
  0x98   :  { %224 = vst [vmem:[#allocation2 + $0x50] sm:$0xff] %v160_v5 }
  0x9a   :  { %v179_v6 = vpop.f32.mrf.mxu2  ;;  %v141_v10 = vpop.f32.mrf.mxu0 }
  0x9b   :  { %v199_v7 = vpop.f32.mrf.mxu3  ;;  %v180_v8 = vadd.f32 %v459_v49, %v179_v6  ;;  %v161_v11 = vpop.f32.mrf.mxu1  ;;  %v142_v12 = vadd.f32 %v459_v49, %v141_v10 }
  0x9c   :  { %v200_v9 = vadd.f32 %v459_v49, %v199_v7  ;;  %v162_v13 = vadd.f32 %v459_v49, %v161_v11 }
  0x9d   :  { %232 = vst [vmem:[#allocation2 + $0x90] sm:$0xff] %v180_v8 }
  0x9e   :  { %240 = vst [vmem:[#allocation2 + $0xd0] sm:$0xff] %v200_v9 }
  0x9f   :  { %217 = vst [vmem:[#allocation2 + $0x18] sm:$0xff] %v142_v12 }
  0xa0   :  { %225 = vst [vmem:[#allocation2 + $0x58] sm:$0xff] %v162_v13 }
  0xa2   :  { %v181_v14 = vpop.f32.mrf.mxu2  ;;  %v144_v18 = vpop.f32.mrf.mxu0 }
  0xa3   :  { %v201_v15 = vpop.f32.mrf.mxu3  ;;  %v182_v16 = vadd.f32 %v459_v49, %v181_v14  ;;  %v164_v19 = vpop.f32.mrf.mxu1  ;;  %v145_v20 = vadd.f32 %v459_v49, %v144_v18 }
  0xa4   :  { %v202_v17 = vadd.f32 %v459_v49, %v201_v15  ;;  %v165_v21 = vadd.f32 %v459_v49, %v164_v19 }
  0xa5   :  { %233 = vst [vmem:[#allocation2 + $0x98] sm:$0xff] %v182_v16 }
  0xa6   :  { %241 = vst [vmem:[#allocation2 + $0xd8] sm:$0xff] %v202_v17 }
  0xa7   :  { %218 = vst [vmem:[#allocation2 + $0x20] sm:$0xff] %v145_v20 }
  0xa8   :  { %226 = vst [vmem:[#allocation2 + $0x60] sm:$0xff] %v165_v21 }
  0xaa   :  { %v184_v22 = vpop.f32.mrf.mxu2  ;;  %v146_v26 = vpop.f32.mrf.mxu0 }
  0xab   :  { %v204_v23 = vpop.f32.mrf.mxu3  ;;  %v185_v24 = vadd.f32 %v459_v49, %v184_v22  ;;  %v166_v27 = vpop.f32.mrf.mxu1  ;;  %v147_v28 = vadd.f32 %v459_v49, %v146_v26 }
  0xac   :  { %v205_v25 = vadd.f32 %v459_v49, %v204_v23  ;;  %v167_v29 = vadd.f32 %v459_v49, %v166_v27 }
  0xad   :  { %234 = vst [vmem:[#allocation2 + $0xa0] sm:$0xff] %v185_v24 }
  0xae   :  { %242 = vst [vmem:[#allocation2 + $0xe0] sm:$0xff] %v205_v25 }
  0xaf   :  { %219 = vst [vmem:[#allocation2 + $0x28] sm:$0xff] %v147_v28 }
  0xb0   :  { %227 = vst [vmem:[#allocation2 + $0x68] sm:$0xff] %v167_v29 }
  0xb2   :  { %v186_v30 = vpop.f32.mrf.mxu2  ;;  %v149_v34 = vpop.f32.mrf.mxu0 }
  0xb3   :  { %v206_v31 = vpop.f32.mrf.mxu3  ;;  %v187_v32 = vadd.f32 %v459_v49, %v186_v30  ;;  %v169_v35 = vpop.f32.mrf.mxu1  ;;  %v150_v36 = vadd.f32 %v459_v49, %v149_v34 }
  0xb4   :  { %v207_v33 = vadd.f32 %v459_v49, %v206_v31  ;;  %v170_v37 = vadd.f32 %v459_v49, %v169_v35 }
  0xb5   :  { %235 = vst [vmem:[#allocation2 + $0xa8] sm:$0xff] %v187_v32 }
  0xb6   :  { %243 = vst [vmem:[#allocation2 + $0xe8] sm:$0xff] %v207_v33 }
  0xb7   :  { %220 = vst [vmem:[#allocation2 + $0x30] sm:$0xff] %v150_v36 }
  0xb8   :  { %228 = vst [vmem:[#allocation2 + $0x70] sm:$0xff] %v170_v37 }
  0xba   :  { %v189_v38 = vpop.f32.mrf.mxu2  ;;  %v151_v42 = vpop.f32.mrf.mxu0 }
  0xbb   :  { %v209_v39 = vpop.f32.mrf.mxu3  ;;  %v190_v40 = vadd.f32 %v459_v49, %v189_v38  ;;  %v171_v43 = vpop.f32.mrf.mxu1  ;;  %v152_v44 = vadd.f32 %v459_v49, %v151_v42 }
  0xbc   :  { %v210_v41 = vadd.f32 %v459_v49, %v209_v39  ;;  %v172_v45 = vadd.f32 %v459_v49, %v171_v43 }
  0xbd   :  { %236 = vst [vmem:[#allocation2 + $0xb0] sm:$0xff] %v190_v40 }
  0xbe   :  { %244 = vst [vmem:[#allocation2 + $0xf0] sm:$0xff] %v210_v41 }
  0xbf   :  { %221 = vst [vmem:[#allocation2 + $0x38] sm:$0xff] %v152_v44 }
  0xc0   :  { %229 = vst [vmem:[#allocation2 + $0x78] sm:$0xff] %v172_v45 }
  0xc2   :  { %v191_v46 = vpop.f32.mrf.mxu2 }
  0xc3   :  { %v211_v47 = vpop.f32.mrf.mxu3  ;;  %v192_v48 = vadd.f32 %v459_v49, %v191_v46 }
  0xc4   :  { %v212_v50 = vadd.f32 %v459_v49, %v211_v47 }
  0xc5   :  { %237 = vst [vmem:[#allocation2 + $0xb8] sm:$0xff] %v192_v48 }
  0xc6   :  { %245 = vst [vmem:[#allocation2 + $0xf8] sm:$0xff] %v212_v50 }
  0xc7   :  { %258 = dma.vmem_to_hbm [thread:$0]  %s251_s2, 4096, %s253_s25, [#allocation3], %s319_s26, %s319_s26, %s320_s27  }
  0xc8   :  { %316 = dma.done.wait [#allocation3], 4096  }
  0xc9   :  { %317 = vsyncadd [#allocation3], 4294963200 }
  0xca   :  { %263 = vsyncpa [#allocation3], 1 }

</bundles_post_ra>
